<compile_context>
chip_gen: v5e
topology: v5e:2x2
jax: 0.10.0
libtpu: 0.0.40
codegen_flags: <defaults>
</compile_context>

<pallas_src>
import math
import functools

import numpy as np
import jax
import jax.numpy as jnp
from jax.experimental import pallas as pl
from jax.experimental.pallas import tpu as pltpu


# ---------------------------------------------------------------------------
# Parameter ("buffer") construction — mirrors PositionalEncoding.__init__
# ---------------------------------------------------------------------------
def make_positional_encoding(d_model: int, max_len: int) -> jnp.ndarray:
    position = jnp.arange(max_len, dtype=jnp.float32)[:, None]                 # [L, 1]
    div_term1 = jnp.exp(jnp.arange(0, d_model, 2, dtype=jnp.float32)
                        * (-math.log(10000.0) / d_model))                      # ceil(D/2)
    div_term2 = jnp.exp(jnp.arange(0, d_model - 1, 2, dtype=jnp.float32)
                        * (-math.log(10000.0) / d_model))                      # floor(D/2)
    pe = jnp.zeros((max_len, 1, d_model), dtype=jnp.float32)
    pe = pe.at[:, 0, 0::2].set(jnp.sin(position * div_term1))
    if d_model % 2 == 1:
        pe = pe.at[:, 0, 1::2].set(jnp.cos(position * div_term2))
    else:
        pe = pe.at[:, 0, 1::2].set(jnp.cos(position * div_term1))
    return pe


# ---------------------------------------------------------------------------
# In-kernel dropout mask: counter-based hash (portable — no pltpu.prng_*).
# ---------------------------------------------------------------------------
def _keep_mask(linear_idx_i32, seed_scalar_i32, p: float):
    """keep = (hash(seed, element index) as uniform in [0,1)) >= p."""
    h = linear_idx_i32.astype(jnp.uint32)
    h = h + seed_scalar_i32.astype(jnp.uint32) * jnp.uint32(0x9E3779B9)
    # splitmix32-style low-bias finalizer: xor/shift/mul on the VPU.
    h = (h ^ (h >> 16)) * jnp.uint32(0x7FEB352D)
    h = (h ^ (h >> 15)) * jnp.uint32(0x846CA68B)
    h = h ^ (h >> 16)
    h31 = (h >> 1).astype(jnp.int32)                       # uniform in [0, 2^31)
    threshold = jnp.int32(min(int(round(p * float(1 << 31))), (1 << 31) - 1))
    return h31 >= threshold


# ---------------------------------------------------------------------------
# Kernels — lane-dense folded layout ([ts, B*D] blocks, pe block is [ts, D])
# ---------------------------------------------------------------------------
def _posenc_kernel_fold(x_ref, pe_ref, o_ref, *, reps):
    pe_b = jnp.tile(pe_ref[...], (1, reps)) if reps > 1 else pe_ref[...]
    o_ref[...] = x_ref[...] + pe_b


def _posenc_dropout_kernel_fold(seed_ref, x_ref, pe_ref, o_ref, *, reps, p):
    ts, w = x_ref.shape
    pe_b = jnp.tile(pe_ref[...], (1, reps)) if reps > 1 else pe_ref[...]
    y = x_ref[...] + pe_b
    rows = jax.lax.broadcasted_iota(jnp.int32, (ts, w), 0) + pl.program_id(0) * ts
    cols = jax.lax.broadcasted_iota(jnp.int32, (ts, w), 1)
    keep = _keep_mask(rows * w + cols, seed_ref[0], p)
    scale = jnp.asarray(1.0 / (1.0 - p), dtype=y.dtype)
    o_ref[...] = jnp.where(keep, y * scale, jnp.asarray(0.0, y.dtype)).astype(o_ref.dtype)


# ---------------------------------------------------------------------------
# Kernels — general 3-D layout ([ts, bt, D] blocks, pe block is [ts, 1, D])
# ---------------------------------------------------------------------------
def _posenc_kernel_3d(x_ref, pe_ref, o_ref):
    o_ref[...] = x_ref[...] + pe_ref[...]           # broadcast over the batch sublanes


def _posenc_dropout_kernel_3d(seed_ref, x_ref, pe_ref, o_ref, *, p, total_batch):
    ts, bt, d = x_ref.shape
    y = x_ref[...] + pe_ref[...]
    rows = jax.lax.broadcasted_iota(jnp.int32, (ts, bt, d), 0) + pl.program_id(0) * ts
    bats = jax.lax.broadcasted_iota(jnp.int32, (ts, bt, d), 1) + pl.program_id(1) * bt
    cols = jax.lax.broadcasted_iota(jnp.int32, (ts, bt, d), 2)
    keep = _keep_mask((rows * total_batch + bats) * d + cols, seed_ref[0], p)
    scale = jnp.asarray(1.0 / (1.0 - p), dtype=y.dtype)
    o_ref[...] = jnp.where(keep, y * scale, jnp.asarray(0.0, y.dtype)).astype(o_ref.dtype)


# ---------------------------------------------------------------------------
# Tiling helpers
# ---------------------------------------------------------------------------
def _divisors(n: int):
    return [d for d in range(1, n + 1) if n % d == 0]


def _target_tile_bytes() -> int:
    # ~1 MiB/buffer hits ~85% of HBM roofline on v5e/v6e; v7x (~3.2 TB/s) wants
    # bigger tiles so the ~0.35 us per-grid-step overhead stays <10%.
    try:
        kind = jax.devices()[0].device_kind.lower()
    except Exception:
        return 1 << 20
    return (4 << 20) if "v7" in kind else (1 << 20)


def _sublane_multiple(dtype) -> int:
    return {4: 8, 2: 16, 1: 32}.get(jnp.dtype(dtype).itemsize, 8)


def _pick_leading_tile(extent, bytes_per_row, target_bytes, sub_multiple=1):
    """Largest divisor of `extent` that fits the byte target, honours the
    dtype-aware sublane multiple, and prefers >=2 grid steps (v7x megacore)."""
    cands = [d for d in sorted(_divisors(extent), reverse=True)
             if d == extent or d % sub_multiple == 0]
    fitting = [d for d in cands if d * bytes_per_row <= target_bytes]
    multi = [d for d in fitting if extent // d >= 2]
    if multi:
        return multi[0]
    if fitting:
        return fitting[0]
    return cands[-1] if cands else extent


def _pick_batch_tile(B, bytes_per_batch, target_bytes):
    cands = [d for d in sorted(_divisors(B), reverse=True) if d == B or d % 8 == 0]
    if not cands:
        cands = [B]
    fitting = [d for d in cands if d * bytes_per_batch <= target_bytes]
    return fitting[0] if fitting else cands[-1]


# ---------------------------------------------------------------------------
# Wrapper
# ---------------------------------------------------------------------------
def positional_encoding_forward(x, pe, *, p: float = 0.1,
                                training: bool = False, seed: int = 0):
    """x: [S, B, D]; pe: [max_len, 1, D].  Returns dropout(x + pe[:S])."""
    S, B, D = x.shape
    dtype = x.dtype
    item = jnp.dtype(dtype).itemsize
    sub_min = _sublane_multiple(dtype)
    target = _target_tile_bytes()
    do_dropout = bool(training) and float(p) > 0.0

    pe_sd = pe[:S, 0, :].astype(dtype)              # [S, D] — never batch-replicated in HBM

    # ---- layout selection: lane-dense fold when the folded lane dim is 128-aligned
    use_fold = (B * D) % 128 == 0
    if use_fold:
        ts = _pick_leading_tile(S, B * D * item, target, sub_multiple=sub_min)
        if ts * B * D * item > (8 << 20):           # would blow scoped VMEM -> use 3-D path
            use_fold = False

    if use_fold:
        x2 = x.reshape(S, B * D)
        grid = (S // ts,)
        out_shape = jax.ShapeDtypeStruct((S, B * D), dtype)
        cparams = pltpu.CompilerParams(
            dimension_semantics=("parallel",),
            vmem_limit_bytes=32 * 1024 * 1024)
        if not do_dropout:
            out2 = pl.pallas_call(
                functools.partial(_posenc_kernel_fold, reps=B),
                grid=grid,
                in_specs=[pl.BlockSpec((ts, B * D), lambda i: (i, 0)),
                          pl.BlockSpec((ts, D), lambda i: (i, 0))],
                out_specs=pl.BlockSpec((ts, B * D), lambda i: (i, 0)),
                out_shape=out_shape,
                compiler_params=cparams,
            )(x2, pe_sd)
        else:
            seed_arr = jnp.array([seed], dtype=jnp.int32)
            out2 = pl.pallas_call(
                functools.partial(_posenc_dropout_kernel_fold, reps=B, p=float(p)),
                grid_spec=pltpu.PrefetchScalarGridSpec(
                    num_scalar_prefetch=1,
                    grid=grid,
                    in_specs=[pl.BlockSpec((ts, B * D), lambda i, s: (i, 0)),
                              pl.BlockSpec((ts, D), lambda i, s: (i, 0))],
                    out_specs=pl.BlockSpec((ts, B * D), lambda i, s: (i, 0))),
                out_shape=out_shape,
                compiler_params=cparams,
            )(seed_arr, x2, pe_sd)
        return out2.reshape(S, B, D)

    # ---- general 3-D path (any B, D; last-two block dims are full extents or 8-multiples)
    # TODO(synk): when D < 128 the lane dim is partially masked on stores; padding the
    # lane axis to a 128 multiple would trade an extra wrapper copy for unmasked vst.
    pe_s1d = pe_sd.reshape(S, 1, D)
    bt = _pick_batch_tile(B, D * item, target)
    ts = _pick_leading_tile(S, bt * D * item, target, sub_multiple=1)
    grid = (S // ts, B // bt)
    out_shape = jax.ShapeDtypeStruct((S, B, D), dtype)
    cparams = pltpu.CompilerParams(
        dimension_semantics=("parallel", "parallel"),
        vmem_limit_bytes=32 * 1024 * 1024)
    if not do_dropout:
        out = pl.pallas_call(
            _posenc_kernel_3d,
            grid=grid,
            in_specs=[pl.BlockSpec((ts, bt, D), lambda i, j: (i, j, 0)),
                      pl.BlockSpec((ts, 1, D), lambda i, j: (i, 0, 0))],
            out_specs=pl.BlockSpec((ts, bt, D), lambda i, j: (i, j, 0)),
            out_shape=out_shape,
            compiler_params=cparams,
        )(x, pe_s1d)
    else:
        seed_arr = jnp.array([seed], dtype=jnp.int32)
        out = pl.pallas_call(
            functools.partial(_posenc_dropout_kernel_3d, p=float(p), total_batch=B),
            grid_spec=pltpu.PrefetchScalarGridSpec(
                num_scalar_prefetch=1,
                grid=grid,
                in_specs=[pl.BlockSpec((ts, bt, D), lambda i, j, s: (i, j, 0)),
                          pl.BlockSpec((ts, 1, D), lambda i, j, s: (i, 0, 0))],
                out_specs=pl.BlockSpec((ts, bt, D), lambda i, j, s: (i, j, 0))),
            out_shape=out_shape,
            compiler_params=cparams,
        )(seed_arr, x, pe_s1d)
    return out


# ---------------------------------------------------------------------------
# Demo / checks
# ---------------------------------------------------------------------------
if __name__ == "__main__":
    d_model = 32
    max_len = 64
    seq_len = 8
    batch = 4
    p_drop = 0.1

    key = jax.random.PRNGKey(0)
    x = jax.random.normal(key, (seq_len, batch, d_model), dtype=jnp.float32)
    pe = make_positional_encoding(d_model, max_len)
    ref = np.asarray(x + pe[:seq_len])

    # Eval path (dropout is identity at inference), lane-dense mode (B*D = 128).
    out = jax.block_until_ready(positional_encoding_forward(x, pe, p=p_drop, training=False))
    np.testing.assert_allclose(np.asarray(out), ref, rtol=1e-6, atol=1e-6)

    # Eval path, non-128-aligned batch -> general 3-D broadcast mode.
    x3 = jax.random.normal(jax.random.PRNGKey(1), (seq_len, 3, d_model), dtype=jnp.float32)
    ref3 = np.asarray(x3 + pe[:seq_len])
    out3 = jax.block_until_ready(positional_encoding_forward(x3, pe, p=p_drop, training=False))
    np.testing.assert_allclose(np.asarray(out3), ref3, rtol=1e-6, atol=1e-6)

    # Training path: kept values must be scaled by 1/(1-p); realized drop rate sane.
    # TODO(synk): the dropout mask is generated by an in-kernel hash PRNG, so it is not
    # bitwise-identical to torch.nn.Dropout's RNG stream (statistically equivalent).
    out_tr = np.asarray(jax.block_until_ready(
        positional_encoding_forward(x, pe, p=p_drop, training=True, seed=0)))
    dropped = out_tr == 0.0
    frac = dropped.mean()
    assert 0.0 < frac < 0.35, f"unexpected drop fraction {frac}"
    kept = ~dropped
    np.testing.assert_allclose(out_tr[kept], ref[kept] / (1.0 - p_drop),
                               rtol=1e-5, atol=1e-5)

    print("KERNEL_OK")
</pallas_src>

<mosaic_0001>
module attributes {stable_mosaic.version = 11 : i64} {
  func.func @_posenc_kernel_fold(%arg0: i32, %arg1: memref<8x128xf32, #tpu.memory_space<vmem>>, %arg2: memref<8x32xf32, #tpu.memory_space<vmem>>, %arg3: memref<8x128xf32, #tpu.memory_space<vmem>>) attributes {dimension_semantics = [#tpu.dimension_semantics<parallel>], iteration_bounds = array<i64: 1>, scalar_prefetch = 0 : i64, scratch_operands = 0 : i64, tpu.core_type = #tpu.core_type<tc>, window_params = [{transform_indices = @transform_0, window_bounds = array<i64: 8, 128>}, {transform_indices = @transform_1, window_bounds = array<i64: 8, 32>}, {transform_indices = @transform_2, window_bounds = array<i64: 8, 128>}]} {
    %c0 = arith.constant 0 : index
    %c0_0 = arith.constant 0 : index
    %0 = vector.load %arg2[%c0, %c0_0] : memref<8x32xf32, #tpu.memory_space<vmem>>, vector<8x32xf32>
    %1 = tpu.concatenate %0, %0, %0, %0 in 1 : vector<8x32xf32>, vector<8x32xf32>, vector<8x32xf32>, vector<8x32xf32> -> vector<8x128xf32>
    %c0_1 = arith.constant 0 : index
    %c0_2 = arith.constant 0 : index
    %2 = vector.load %arg1[%c0_1, %c0_2] : memref<8x128xf32, #tpu.memory_space<vmem>>, vector<8x128xf32>
    %3 = arith.addf %2, %1 : vector<8x128xf32>
    %c0_3 = arith.constant 0 : index
    %c0_4 = arith.constant 0 : index
    %4 = vector.load %arg3[%c0_3, %c0_4] : memref<8x128xf32, #tpu.memory_space<vmem>>, vector<8x128xf32>
    tpu.vector_store %arg3[%c0_3, %c0_4], %3 {strides = array<i32>} : memref<8x128xf32, #tpu.memory_space<vmem>>, vector<8x128xf32>,
    return
  }
  func.func @transform_0(%arg0: i32) -> (i32, i32) {
    %c0_i32 = arith.constant 0 : i32
    %c0_i32_0 = arith.constant 0 : i32
    return %arg0, %c0_i32 : i32, i32
  }
  func.func @transform_1(%arg0: i32) -> (i32, i32) {
    %c0_i32 = arith.constant 0 : i32
    %c0_i32_0 = arith.constant 0 : i32
    return %arg0, %c0_i32 : i32, i32
  }
  func.func @transform_2(%arg0: i32) -> (i32, i32) {
    %c0_i32 = arith.constant 0 : i32
    %c0_i32_0 = arith.constant 0 : i32
    return %arg0, %c0_i32 : i32, i32
  }
}

</mosaic_0001>

<bundles_post_ra>
// kernel: tpu_custom_call.1
= control target key start
LH: loop header
LB: loop body
LE: loop exit
PB: predicated region body
PF: predicated region fallthrough
CT: control target
= control target key end

     0   :  { %7 = vsyncpa [#allocation3], 0  ;;  %s192_s0 = inlined_call_operand.hbm [shape: f32[8,128], index: 0, kind: input, shape index: {}]   ;;  %s193_s1 = inlined_call_operand.hbm [shape: f32[8,32], index: 1, kind: input, shape index: {}]   ;;  %s194_s2 = inlined_call_operand.hbm [shape: f32[8,128], index: 2, kind: output, shape index: {}]  }
   0x1   :  { %8 = vsyncpa [#allocation6], 0 }
   0x2   :  { %9 = vsyncpa [#allocation4], 0  ;;  %s15_s11 = sshll.u32 %s192_s0, 4  ;;  %s162_s12 = smov [#allocation2]   ;;  %s16_s11 = int_to_ptr.hbm [resolvable:$true] %s15_s11 }
   0x3   :  { %s17_s13 = sshll.u32 %s162_s12, 4  ;;  %s26_s16 = sshll.u32 %s193_s1, 4  ;;  %s18_s13 = int_to_ptr.vmem [resolvable:$true] %s17_s13  ;;  %s27_s16 = int_to_ptr.hbm [resolvable:$true] %s26_s16 }
   0x4   :  { %20 = dma.hbm_to_vmem [thread:$0]  %s16_s11, 128, %s18_s13, [#allocation3]  }
   0x5   :  { %s163_s17 = smov [#allocation5]  }
   0x6   :  { %s28_s18 = sshll.u32 %s163_s17, 4  ;;  %s29_s18 = int_to_ptr.vmem [resolvable:$true] %s28_s18 }
   0x7   :  { %31 = dma.hbm_to_vmem [thread:$0]  %s27_s16, 128, %s29_s18, [#allocation6]  }
   0x8   :  { %156 = dma.done.wait [#allocation3], 128  }
   0x9   :  { %157 = vsyncadd [#allocation3], 4294967168 }
   0xa   :  { %158 = dma.done.wait [#allocation6], 128  }
   0xb   :  { %159 = vsyncadd [#allocation6], 4294967168  ;;  %v40_v0 = vld [vmem:[#allocation5] sm:$0xff]  ;;  %s164_s0 = smov 32   ;;  %s165_s19 = smov 96   ;;  %vm51_vm0 = vcmask 261120  }
   0xc   :  { %42 = vrot.lane.b32.xlu0 %v40_v0, %s164_s0  ;;  %48 = vrot.lane.b32.xlu1 %v40_v0, %s165_s19  ;;  %s166_s20 = smov 64   ;;  %vm53_vm1 = vcmask 523264   ;;  %vm55_vm2 = vcmask 785408   ;;  %v57_v5 = vld [vmem:[#allocation2] sm:$0xff]  ;;  %s167_s1 = smov [#allocation7]  }
   0xd   :  { %s65_s21 = sshll.u32 %s167_s1, 4  ;;  %s67_s24 = sshll.u32 %s194_s2, 4  ;;  %s66_s21 = int_to_ptr.vmem [resolvable:$true] %s65_s21  ;;  %s68_s24 = int_to_ptr.hbm [resolvable:$true] %s67_s24 }
  0x14   :  { %45 = vrot.lane.b32.xlu0 %v40_v0, %s166_s20 }
  0x7e   :  { %v43_v1 = vpop.permute.xlu0 %42  ;;  %v49_v2 = vpop.permute.xlu1 %48 }
  0x7f   :  { %v52_v3 = vsel %vm51_vm0, %v40_v0, %v43_v1 }
  0x86   :  { %v46_v4 = vpop.permute.xlu0 %45 }
  0x87   :  { %v54_v6 = vsel %vm53_vm1, %v52_v3, %v46_v4 }
  0x88   :  { %v56_v7 = vsel %vm55_vm2, %v54_v6, %v49_v2 }
  0x89   :  { %v58_v8 = vadd.f32 %v57_v5, %v56_v7 }
  0x8b   :  { %59 = vst [vmem:[#allocation7] sm:$0xff] %v58_v8 }
  0x8c   :  { %70 = dma.vmem_to_hbm [thread:$0]  %s66_s21, 128, %s68_s24, [#allocation4]  }
  0x8d   :  { %160 = dma.done.wait [#allocation4], 128  }
  0x8e   :  { %161 = vsyncadd [#allocation4], 4294967168 }
  0x8f   :  { %75 = vsyncpa [#allocation3], 1 }
  0x90   :  { %76 = vsyncpa [#allocation6], 1 }
  0x91   :  { %77 = vsyncpa [#allocation4], 1 }

</bundles_post_ra>
